<compile_context>
chip_gen: v7x
topology: tpu7x:2x2x1
jax: 0.10.0
libtpu: 0.0.40
codegen_flags: <defaults>
</compile_context>

<pallas_src>
import functools

import jax
import jax.numpy as jnp
from jax.experimental import pallas as pl
from jax.experimental.pallas import tpu as pltpu


def _round_up(n, m):
    return ((n + m - 1) // m) * m


def net_kernel(x_ref, w1_ref, b1_ref, w2_ref, b2_ref, w3_ref, b3_ref,
               wq_ref, bq_ref, q_ref):
    """Fused dueling-DQN MLP forward for one batch tile (head pre-folded)."""
    # state = state.to(torch.float32); matmuls use the bf16 MXU path with f32
    # accumulation, elementwise math stays in f32.
    x = x_ref[...].astype(jnp.float32)

    # lin1 = Linear(state_dim, 256) + ReLU
    f = jnp.dot(x.astype(jnp.bfloat16), w1_ref[...],
                preferred_element_type=jnp.float32) + b1_ref[...]
    f = jnp.maximum(f, 0.0)

    # lin2 = Linear(256, 512) + ReLU
    f = jnp.dot(f.astype(jnp.bfloat16), w2_ref[...],
                preferred_element_type=jnp.float32) + b2_ref[...]
    f = jnp.maximum(f, 0.0)

    # lin3 = Linear(512, 256) + ReLU
    f = jnp.dot(f.astype(jnp.bfloat16), w3_ref[...],
                preferred_element_type=jnp.float32) + b3_ref[...]
    f = jnp.maximum(f, 0.0)

    # Folded head: Q = f @ wq + bq  (wq/bq already encode V + A - mean(A)).
    # Padded columns (>= action_dim) are exactly zero and sliced off outside;
    # keeping the store 128-lane wide avoids masked partial stores.
    q_ref[...] = jnp.dot(f.astype(jnp.bfloat16), wq_ref[...],
                         preferred_element_type=jnp.float32) + bq_ref[...]


def prepare_params(params, action_dim):
    """Fold the dueling head and cast raw params into the fused layout."""
    w1, b1, w2, b2, w3, b3, wa, ba, wv, bv = params
    hidden = wa.shape[0]
    n_pad = _round_up(max(action_dim, 1), 128)

    wa = wa.astype(jnp.float32)
    ba = jnp.reshape(ba, (1, -1)).astype(jnp.float32)
    wv = wv.astype(jnp.float32)            # (hidden, 1)
    bv = jnp.reshape(bv, (1, 1)).astype(jnp.float32)

    # Q = V + (A - mean(A))  is linear in f, so fold it into a single Linear:
    #   wq[:, j] = wa[:, j] - mean_k wa[:, k] + wv
    #   bq[j]    = ba[j]    - mean_k ba[k]    + bv
    wq = wa - jnp.mean(wa, axis=1, keepdims=True) + wv
    bq = ba - jnp.mean(ba, axis=1, keepdims=True) + bv

    wq_pad = jnp.zeros((hidden, n_pad), jnp.float32).at[:, :action_dim].set(wq)
    bq_pad = jnp.zeros((1, n_pad), jnp.float32).at[:, :action_dim].set(bq)

    prepared = (w1.astype(jnp.bfloat16), jnp.reshape(b1, (1, -1)).astype(jnp.float32),
                w2.astype(jnp.bfloat16), jnp.reshape(b2, (1, -1)).astype(jnp.float32),
                w3.astype(jnp.bfloat16), jnp.reshape(b3, (1, -1)).astype(jnp.float32),
                wq_pad.astype(jnp.bfloat16), bq_pad)
    return prepared, n_pad


def net_forward(state, params, *, batch_tile=None):
    """Runs the fused NET forward pass as a Pallas kernel."""
    wa = params[6]
    action_dim = wa.shape[1]
    prepared, n_pad = prepare_params(params, action_dim)
    w1, b1, w2, b2, w3, b3, wq, bq = prepared

    B, state_dim = state.shape

    # Sublane-aligned batch tile; capped at 512 rows so large batches get a
    # multi-step "parallel" grid (pipelining + megacore sharding on v7x).
    b_min = _round_up(max(B, 8), 8)
    tb = batch_tile if batch_tile is not None else min(512, b_min)
    tb = _round_up(min(tb, b_min), 8)
    n_tiles = pl.cdiv(b_min, tb)
    b_pad = n_tiles * tb

    x = state.astype(jnp.float32)
    if b_pad != B:
        x = jnp.zeros((b_pad, state_dim), jnp.float32).at[:B, :].set(x)

    full = lambda a: pl.BlockSpec(a.shape, lambda i: (0, 0))

    h1, h2, h3 = w1.shape[1], w2.shape[1], w3.shape[1]
    flops = 2 * b_pad * (state_dim * h1 + h1 * h2 + h2 * h3 + h3 * n_pad)
    bytes_accessed = (2 * (w1.size + w2.size + w3.size + wq.size)    # bf16 weights
                      + 4 * (b1.size + b2.size + b3.size + bq.size)  # f32 biases
                      + 4 * b_pad * (state_dim + n_pad))             # in + out

    q_pad = pl.pallas_call(
        net_kernel,
        out_shape=jax.ShapeDtypeStruct((b_pad, n_pad), jnp.float32),
        grid=(n_tiles,),
        in_specs=[
            pl.BlockSpec((tb, state_dim), lambda i: (i, 0)),   # state (batch-tiled)
            full(w1), full(b1),
            full(w2), full(b2),
            full(w3), full(b3),
            full(wq), full(bq),
        ],
        out_specs=pl.BlockSpec((tb, n_pad), lambda i: (i, 0)),
        compiler_params=pltpu.CompilerParams(
            dimension_semantics=("parallel",),
            vmem_limit_bytes=32 * 1024 * 1024),
        cost_estimate=pl.CostEstimate(
            flops=int(flops), transcendentals=0,
            bytes_accessed=int(bytes_accessed)),
    )(x, w1, b1, w2, b2, w3, b3, wq, bq)

    return q_pad[:B, :action_dim]


def init_params(key, state_dim, action_dim):
    """Deterministic synthetic weights (shapes match the nn.Linear layers)."""
    dims = [
        (state_dim, 256),   # lin1
        (256, 512),         # lin2
        (512, 256),         # lin3
        (256, action_dim),  # lin_a
        (256, 1),           # lin_v
    ]
    params = []
    for (din, dout) in dims:
        key, kw, kb = jax.random.split(key, 3)
        bound = 1.0 / jnp.sqrt(din)
        w = jax.random.uniform(kw, (din, dout), jnp.float32, -bound, bound)
        b = jax.random.uniform(kb, (1, dout), jnp.float32, -bound, bound)
        params.extend([w, b])
    # order: w1,b1,w2,b2,w3,b3,wa,ba,wv,bv
    return tuple(params)


def net_reference(state, params):
    """Plain-JAX f32 reference matching the PyTorch forward exactly."""
    w1, b1, w2, b2, w3, b3, wa, ba, wv, bv = params
    x = state.astype(jnp.float32)
    f = jnp.maximum(x @ w1 + b1, 0.0)
    f = jnp.maximum(f @ w2 + b2, 0.0)
    f = jnp.maximum(f @ w3 + b3, 0.0)
    v = f @ wv + bv
    a = f @ wa + ba
    return v + (a - jnp.mean(a, axis=1, keepdims=True))


def net_reference_bf16(state, prepared, action_dim):
    """Precision-matched reference (bf16 matmuls, f32 accum, folded head)."""
    w1, b1, w2, b2, w3, b3, wq, bq = prepared
    x = state.astype(jnp.float32)
    f = jnp.maximum(jnp.dot(x.astype(jnp.bfloat16), w1,
                            preferred_element_type=jnp.float32) + b1, 0.0)
    f = jnp.maximum(jnp.dot(f.astype(jnp.bfloat16), w2,
                            preferred_element_type=jnp.float32) + b2, 0.0)
    f = jnp.maximum(jnp.dot(f.astype(jnp.bfloat16), w3,
                            preferred_element_type=jnp.float32) + b3, 0.0)
    q = jnp.dot(f.astype(jnp.bfloat16), wq,
                preferred_element_type=jnp.float32) + bq
    return q[:, :action_dim]


if __name__ == "__main__":
    B, STATE_DIM, ACTION_DIM = 8, 32, 8

    key = jax.random.PRNGKey(0)
    key, kx = jax.random.split(key)
    state = jax.random.normal(kx, (B, STATE_DIM), jnp.float32)

    params = init_params(key, STATE_DIM, ACTION_DIM)

    q = jax.block_until_ready(net_forward(state, params))
    assert q.shape == (B, ACTION_DIM)

    # Tight check vs precision-matched (bf16-matmul, folded-head) reference.
    prepared, _ = prepare_params(params, ACTION_DIM)
    q_bf16 = net_reference_bf16(state, prepared, ACTION_DIM)
    assert jnp.allclose(q, q_bf16, atol=1e-3, rtol=1e-3), "mismatch vs bf16 reference"

    # Loose check vs the full-f32 PyTorch-equivalent reference (bf16 drift).
    q_f32 = net_reference(state, params)
    assert jnp.allclose(q, q_f32, atol=5e-2, rtol=5e-2), "mismatch vs f32 reference"

    print("KERNEL_OK")
</pallas_src>

<mosaic_0001>
module attributes {stable_mosaic.version = 11 : i64} {
  func.func @net_kernel(%arg0: i32, %arg1: memref<8x32xf32, #tpu.memory_space<vmem>>, %arg2: memref<32x256xbf16, #tpu.memory_space<vmem>>, %arg3: memref<1x256xf32, #tpu.memory_space<vmem>>, %arg4: memref<256x512xbf16, #tpu.memory_space<vmem>>, %arg5: memref<1x512xf32, #tpu.memory_space<vmem>>, %arg6: memref<512x256xbf16, #tpu.memory_space<vmem>>, %arg7: memref<1x256xf32, #tpu.memory_space<vmem>>, %arg8: memref<256x128xbf16, #tpu.memory_space<vmem>>, %arg9: memref<1x128xf32, #tpu.memory_space<vmem>>, %arg10: memref<8x128xf32, #tpu.memory_space<vmem>>) attributes {dimension_semantics = [#tpu.dimension_semantics<parallel>], iteration_bounds = array<i64: 1>, scalar_prefetch = 0 : i64, scratch_operands = 0 : i64, tpu.core_type = #tpu.core_type<tc>, window_params = [{transform_indices = @transform_0, window_bounds = array<i64: 8, 32>}, {pipeline_mode = #tpu.pipeline_mode<synchronous>, transform_indices = @transform_1, window_bounds = array<i64: 32, 256>}, {pipeline_mode = #tpu.pipeline_mode<synchronous>, transform_indices = @transform_2, window_bounds = array<i64: 1, 256>}, {pipeline_mode = #tpu.pipeline_mode<synchronous>, transform_indices = @transform_3, window_bounds = array<i64: 256, 512>}, {pipeline_mode = #tpu.pipeline_mode<synchronous>, transform_indices = @transform_4, window_bounds = array<i64: 1, 512>}, {pipeline_mode = #tpu.pipeline_mode<synchronous>, transform_indices = @transform_5, window_bounds = array<i64: 512, 256>}, {pipeline_mode = #tpu.pipeline_mode<synchronous>, transform_indices = @transform_6, window_bounds = array<i64: 1, 256>}, {pipeline_mode = #tpu.pipeline_mode<synchronous>, transform_indices = @transform_7, window_bounds = array<i64: 256, 128>}, {pipeline_mode = #tpu.pipeline_mode<synchronous>, transform_indices = @transform_8, window_bounds = array<i64: 1, 128>}, {transform_indices = @transform_9, window_bounds = array<i64: 8, 128>}]} {
    %c0 = arith.constant 0 : index
    %c0_0 = arith.constant 0 : index
    %0 = vector.load %arg1[%c0, %c0_0] : memref<8x32xf32, #tpu.memory_space<vmem>>, vector<8x32xf32>
    %1 = arith.truncf %0 : vector<8x32xf32> to vector<8x32xbf16>
    %c0_1 = arith.constant 0 : index
    %c0_2 = arith.constant 0 : index
    %2 = vector.load %arg2[%c0_1, %c0_2] : memref<32x256xbf16, #tpu.memory_space<vmem>>, vector<32x256xbf16>
    %cst = arith.constant dense<0.000000e+00> : vector<8x256xf32>
    %3 = tpu.matmul %1, %2, %cst {dimension_numbers = #tpu.dot_dimension_numbers<[1], [0], [0], [1], [0, 0, 1, 1], [], []>} : vector<8x32xbf16>, vector<32x256xbf16>, vector<8x256xf32> -> vector<8x256xf32>
    %c0_3 = arith.constant 0 : index
    %c0_4 = arith.constant 0 : index
    %4 = vector.load %arg3[%c0_3, %c0_4] : memref<1x256xf32, #tpu.memory_space<vmem>>, vector<1x256xf32>
    %5 = vector.broadcast %4 : vector<1x256xf32> to vector<8x256xf32>
    %6 = arith.addf %3, %5 : vector<8x256xf32>
    %cst_5 = arith.constant 0.000000e+00 : f32
    %7 = vector.broadcast %cst_5 : f32 to vector<8x256xf32>
    %8 = arith.maximumf %6, %7 : vector<8x256xf32>
    %9 = arith.truncf %8 : vector<8x256xf32> to vector<8x256xbf16>
    %c0_6 = arith.constant 0 : index
    %c0_7 = arith.constant 0 : index
    %10 = vector.load %arg4[%c0_6, %c0_7] : memref<256x512xbf16, #tpu.memory_space<vmem>>, vector<256x512xbf16>
    %cst_8 = arith.constant dense<0.000000e+00> : vector<8x512xf32>
    %11 = tpu.matmul %9, %10, %cst_8 {dimension_numbers = #tpu.dot_dimension_numbers<[1], [0], [0], [1], [0, 0, 1, 1], [], []>} : vector<8x256xbf16>, vector<256x512xbf16>, vector<8x512xf32> -> vector<8x512xf32>
    %c0_9 = arith.constant 0 : index
    %c0_10 = arith.constant 0 : index
    %12 = vector.load %arg5[%c0_9, %c0_10] : memref<1x512xf32, #tpu.memory_space<vmem>>, vector<1x512xf32>
    %13 = vector.broadcast %12 : vector<1x512xf32> to vector<8x512xf32>
    %14 = arith.addf %11, %13 : vector<8x512xf32>
    %cst_11 = arith.constant 0.000000e+00 : f32
    %15 = vector.broadcast %cst_11 : f32 to vector<8x512xf32>
    %16 = arith.maximumf %14, %15 : vector<8x512xf32>
    %17 = arith.truncf %16 : vector<8x512xf32> to vector<8x512xbf16>
    %c0_12 = arith.constant 0 : index
    %c0_13 = arith.constant 0 : index
    %18 = vector.load %arg6[%c0_12, %c0_13] : memref<512x256xbf16, #tpu.memory_space<vmem>>, vector<512x256xbf16>
    %cst_14 = arith.constant dense<0.000000e+00> : vector<8x256xf32>
    %19 = tpu.matmul %17, %18, %cst_14 {dimension_numbers = #tpu.dot_dimension_numbers<[1], [0], [0], [1], [0, 0, 1, 1], [], []>} : vector<8x512xbf16>, vector<512x256xbf16>, vector<8x256xf32> -> vector<8x256xf32>
    %c0_15 = arith.constant 0 : index
    %c0_16 = arith.constant 0 : index
    %20 = vector.load %arg7[%c0_15, %c0_16] : memref<1x256xf32, #tpu.memory_space<vmem>>, vector<1x256xf32>
    %21 = vector.broadcast %20 : vector<1x256xf32> to vector<8x256xf32>
    %22 = arith.addf %19, %21 : vector<8x256xf32>
    %cst_17 = arith.constant 0.000000e+00 : f32
    %23 = vector.broadcast %cst_17 : f32 to vector<8x256xf32>
    %24 = arith.maximumf %22, %23 : vector<8x256xf32>
    %25 = arith.truncf %24 : vector<8x256xf32> to vector<8x256xbf16>
    %c0_18 = arith.constant 0 : index
    %c0_19 = arith.constant 0 : index
    %26 = vector.load %arg8[%c0_18, %c0_19] : memref<256x128xbf16, #tpu.memory_space<vmem>>, vector<256x128xbf16>
    %cst_20 = arith.constant dense<0.000000e+00> : vector<8x128xf32>
    %27 = tpu.matmul %25, %26, %cst_20 {dimension_numbers = #tpu.dot_dimension_numbers<[1], [0], [0], [1], [0, 0, 1, 1], [], []>} : vector<8x256xbf16>, vector<256x128xbf16>, vector<8x128xf32> -> vector<8x128xf32>
    %c0_21 = arith.constant 0 : index
    %c0_22 = arith.constant 0 : index
    %28 = vector.load %arg9[%c0_21, %c0_22] : memref<1x128xf32, #tpu.memory_space<vmem>>, vector<1x128xf32>
    %29 = vector.broadcast %28 : vector<1x128xf32> to vector<8x128xf32>
    %30 = arith.addf %27, %29 : vector<8x128xf32>
    %c0_23 = arith.constant 0 : index
    %c0_24 = arith.constant 0 : index
    %31 = vector.load %arg10[%c0_23, %c0_24] : memref<8x128xf32, #tpu.memory_space<vmem>>, vector<8x128xf32>
    tpu.vector_store %arg10[%c0_23, %c0_24], %30 {strides = array<i32>} : memref<8x128xf32, #tpu.memory_space<vmem>>, vector<8x128xf32>,
    return
  }
  func.func @transform_0(%arg0: i32) -> (i32, i32) {
    %c0_i32 = arith.constant 0 : i32
    %c0_i32_0 = arith.constant 0 : i32
    return %arg0, %c0_i32 : i32, i32
  }
  func.func @transform_1(%arg0: i32) -> (i32, i32) {
    %c0_i32 = arith.constant 0 : i32
    %c0_i32_0 = arith.constant 0 : i32
    %c0_i32_1 = arith.constant 0 : i32
    return %c0_i32, %c0_i32_0 : i32, i32
  }
  func.func @transform_2(%arg0: i32) -> (i32, i32) {
    %c0_i32 = arith.constant 0 : i32
    %c0_i32_0 = arith.constant 0 : i32
    %c0_i32_1 = arith.constant 0 : i32
    return %c0_i32, %c0_i32_0 : i32, i32
  }
  func.func @transform_3(%arg0: i32) -> (i32, i32) {
    %c0_i32 = arith.constant 0 : i32
    %c0_i32_0 = arith.constant 0 : i32
    %c0_i32_1 = arith.constant 0 : i32
    return %c0_i32, %c0_i32_0 : i32, i32
  }
  func.func @transform_4(%arg0: i32) -> (i32, i32) {
    %c0_i32 = arith.constant 0 : i32
    %c0_i32_0 = arith.constant 0 : i32
    %c0_i32_1 = arith.constant 0 : i32
    return %c0_i32, %c0_i32_0 : i32, i32
  }
  func.func @transform_5(%arg0: i32) -> (i32, i32) {
    %c0_i32 = arith.constant 0 : i32
    %c0_i32_0 = arith.constant 0 : i32
    %c0_i32_1 = arith.constant 0 : i32
    return %c0_i32, %c0_i32_0 : i32, i32
  }
  func.func @transform_6(%arg0: i32) -> (i32, i32) {
    %c0_i32 = arith.constant 0 : i32
    %c0_i32_0 = arith.constant 0 : i32
    %c0_i32_1 = arith.constant 0 : i32
    return %c0_i32, %c0_i32_0 : i32, i32
  }
  func.func @transform_7(%arg0: i32) -> (i32, i32) {
    %c0_i32 = arith.constant 0 : i32
    %c0_i32_0 = arith.constant 0 : i32
    %c0_i32_1 = arith.constant 0 : i32
    return %c0_i32, %c0_i32_0 : i32, i32
  }
  func.func @transform_8(%arg0: i32) -> (i32, i32) {
    %c0_i32 = arith.constant 0 : i32
    %c0_i32_0 = arith.constant 0 : i32
    %c0_i32_1 = arith.constant 0 : i32
    return %c0_i32, %c0_i32_0 : i32, i32
  }
  func.func @transform_9(%arg0: i32) -> (i32, i32) {
    %c0_i32 = arith.constant 0 : i32
    %c0_i32_0 = arith.constant 0 : i32
    return %arg0, %c0_i32 : i32, i32
  }
}

</mosaic_0001>

<bundles_post_ra>
// kernel: tpu_custom_call.1
= control target key start
LH: loop header
LB: loop body
LE: loop exit
PB: predicated region body
PF: predicated region fallthrough
CT: control target
= control target key end

     0   :  { %14 = vsyncpa [#allocation3], 0  ;;  %s2076_s0 = inlined_call_operand.hbm [shape: f32[8,32], index: 0, kind: input, shape index: {}]   ;;  %s2077_s1 = inlined_call_operand.hbm [shape: bf16[32,256], index: 1, kind: input, shape index: {}]   ;;  %s2078_s2 = inlined_call_operand.vmem [shape: f32[1,256], index: 2, kind: input, shape index: {}]   ;;  %s2079_s3 = inlined_call_operand.hbm [shape: bf16[256,512], index: 3, kind: input, shape index: {}]   ;;  %s2080_s4 = inlined_call_operand.vmem [shape: f32[1,512], index: 4, kind: input, shape index: {}]   ;;  %s2081_s5 = inlined_call_operand.hbm [shape: bf16[512,256], index: 5, kind: input, shape index: {}]   ;;  %s2082_s6 = inlined_call_operand.vmem [shape: f32[1,256], index: 6, kind: input, shape index: {}]   ;;  %s2083_s7 = inlined_call_operand.hbm [shape: bf16[256,128], index: 7, kind: input, shape index: {}]   ;;  %s2084_s8 = inlined_call_operand.vmem [shape: f32[1,128], index: 8, kind: input, shape index: {}]   ;;  %s2085_s9 = inlined_call_operand.hbm [shape: f32[8,128], index: 9, kind: output, shape index: {}]  }
   0x1   :  { %15 = vsyncpa [#allocation6], 0 }
   0x2   :  { %16 = vsyncpa [#allocation9], 0 }
   0x3   :  { %17 = vsyncpa [#allocation4], 0  ;;  %s1903_s30 = smov [#allocation5]   ;;  %s1763_s13 = scalar_lea.hbm %s2077_s1, 512 }
   0x4   :  { %s33_s10 = sshll.u32 %s1903_s30, 4  ;;  %p1764_p0 = scmp.ne.s32.totalorder %s2077_s1, %s1763_s13  ;;  %s34_s10 = int_to_ptr.vmem [resolvable:$true] %s33_s10 }
   0x5   :  { %p1767_p1 = scmp.lt.u32.totalorder %s1763_s13, %s2077_s1 }
   0x7   :  { %p1769_p2 = pnand %p1767_p1, %p1764_p0 }
   0x9   :  { %1772 = shalt.err (!%p1769_p2)
}
   0xa   :  { %s1773_s18 = scalar_lea.vmem %s34_s10, 512  ;;  %p1778_p4 = scmp.lt.s32.totalorder %s34_s10, %s34_s10 }
   0xb   :  { %p1774_p3 = scmp.ne.s32.totalorder %s34_s10, %s1773_s18  ;;  %p1779_p5 = scmp.lt.s32.totalorder %s1773_s18, %s1773_s18 }
   0xd   :  { %p1780_p6 = por %p1779_p5, %p1778_p4 }
   0xf   :  { %p1781_p7 = pnand %p1780_p6, %p1774_p3 }
  0x11   :  { %1784 = shalt.err (!%p1781_p7)
}
  0x12   :  { %s1904_s19 = smov 128   ;;  %s1905_s20 = smov 8  }
  0x13   :  { %39 = dma.hbm_to_vmem [thread:$0]  %s2077_s1, 512, %s34_s10, [#allocation6], %s1904_s19, %s1904_s19, %s1905_s20  }
  0x14   :  { %s1906_s23 = smov [#allocation8]   ;;  %s1907_s25 = smov [#allocation2]  }
  0x15   :  { %s61_s24 = sshll.u32 %s1906_s23, 4  ;;  %s24_s26 = sshll.u32 %s1907_s25, 4  ;;  %s62_s24 = int_to_ptr.vmem [resolvable:$true] %s61_s24  ;;  %s25_s26 = int_to_ptr.vmem [resolvable:$true] %s24_s26 }
  0x16   :  { %s1785_s29 = scalar_lea.hbm %s2081_s5, 8192 }
  0x17   :  { %p1786_p8 = scmp.ne.s32.totalorder %s2081_s5, %s1785_s29  ;;  %p1789_p9 = scmp.lt.u32.totalorder %s1785_s29, %s2081_s5 }
  0x19   :  { %p1791_p10 = pnand %p1789_p9, %p1786_p8 }
  0x1b   :  { %1794 = shalt.err (!%p1791_p10)
}
  0x1c   :  { %s1795_s1 = scalar_lea.vmem %s62_s24, 8192  ;;  %p1800_p12 = scmp.lt.s32.totalorder %s62_s24, %s62_s24 }
  0x1d   :  { %p1796_p11 = scmp.ne.s32.totalorder %s62_s24, %s1795_s1  ;;  %p1801_p13 = scmp.lt.s32.totalorder %s1795_s1, %s1795_s1 }
  0x1f   :  { %p1802_p0 = por %p1801_p13, %p1800_p12 }
  0x21   :  { %p1803_p1 = pnand %p1802_p0, %p1796_p11 }
  0x23   :  { %1806 = shalt.err (!%p1803_p1)
}
  0x24   :  { %67 = dma.hbm_to_vmem [thread:$0]  %s2081_s5, 8192, %s62_s24, [#allocation9], %s1904_s19, %s1904_s19, %s1905_s20  }
  0x25   :  { %s1807_s17 = scalar_lea.hbm %s2076_s0, 128 }
  0x26   :  { %p1808_p2 = scmp.ne.s32.totalorder %s2076_s0, %s1807_s17  ;;  %p1811_p3 = scmp.lt.u32.totalorder %s1807_s17, %s2076_s0 }
  0x28   :  { %p1813_p4 = pnand %p1811_p3, %p1808_p2 }
  0x2a   :  { %1816 = shalt.err (!%p1813_p4)
}
  0x2b   :  { %s1817_s25 = scalar_lea.vmem %s25_s26, 128  ;;  %p1822_p6 = scmp.lt.s32.totalorder %s25_s26, %s25_s26 }
  0x2c   :  { %p1818_p5 = scmp.ne.s32.totalorder %s25_s26, %s1817_s25  ;;  %p1823_p7 = scmp.lt.s32.totalorder %s1817_s25, %s1817_s25 }
  0x2e   :  { %p1824_p8 = por %p1823_p7, %p1822_p6 }
  0x30   :  { %p1825_p9 = pnand %p1824_p8, %p1818_p5 }
  0x32   :  { %1828 = shalt.err (!%p1825_p9)
}
  0x33   :  { %27 = dma.hbm_to_vmem [thread:$0]  %s2076_s0, 128, %s25_s26, [#allocation3]  }
  0x34   :  { %s1908_s20 = smov [#allocation7]   ;;  %s1829_s29 = scalar_lea.hbm %s2079_s3, 8192 }
  0x35   :  { %s47_s24 = sshll.u32 %s1908_s20, 4  ;;  %p1830_p10 = scmp.ne.s32.totalorder %s2079_s3, %s1829_s29  ;;  %s48_s24 = int_to_ptr.vmem [resolvable:$true] %s47_s24 }
  0x36   :  { %p1833_p11 = scmp.lt.u32.totalorder %s1829_s29, %s2079_s3 }
  0x38   :  { %p1835_p12 = pnand %p1833_p11, %p1830_p10 }
  0x3a   :  { %1838 = shalt.err (!%p1835_p12)
}
  0x3b   :  { %s1839_s1 = scalar_lea.vmem %s48_s24, 8192  ;;  %p1844_p0 = scmp.lt.s32.totalorder %s48_s24, %s48_s24 }
  0x3c   :  { %p1840_p13 = scmp.ne.s32.totalorder %s48_s24, %s1839_s1  ;;  %p1845_p1 = scmp.lt.s32.totalorder %s1839_s1, %s1839_s1 }
  0x3e   :  { %p1846_p2 = por %p1845_p1, %p1844_p0 }
  0x40   :  { %p1847_p3 = pnand %p1846_p2, %p1840_p13 }
  0x42   :  { %1850 = shalt.err (!%p1847_p3)
}
  0x43   :  { %s1909_s0 = smov 256   ;;  %s1910_s26 = smov 16  }
  0x44   :  { %53 = dma.hbm_to_vmem [thread:$0]  %s2079_s3, 8192, %s48_s24, [#allocation6], %s1909_s0, %s1909_s0, %s1910_s26  }
  0x45   :  { %s1911_s15 = smov [#allocation10]   ;;  %s1851_s21 = scalar_lea.hbm %s2083_s7, 2048 }
  0x46   :  { %s75_s16 = sshll.u32 %s1911_s15, 4  ;;  %p1852_p4 = scmp.ne.s32.totalorder %s2083_s7, %s1851_s21  ;;  %s76_s16 = int_to_ptr.vmem [resolvable:$true] %s75_s16 }
  0x47   :  { %p1855_p5 = scmp.lt.u32.totalorder %s1851_s21, %s2083_s7 }
  0x49   :  { %p1857_p6 = pnand %p1855_p5, %p1852_p4 }
  0x4b   :  { %1860 = shalt.err (!%p1857_p6)
}
  0x4c   :  { %s1861_s19 = scalar_lea.vmem %s76_s16, 2048  ;;  %p1866_p8 = scmp.lt.s32.totalorder %s76_s16, %s76_s16 }
  0x4d   :  { %p1862_p7 = scmp.ne.s32.totalorder %s76_s16, %s1861_s19  ;;  %p1867_p9 = scmp.lt.s32.totalorder %s1861_s19, %s1861_s19 }
  0x4f   :  { %p1868_p10 = por %p1867_p9, %p1866_p8 }
  0x51   :  { %p1869_p11 = pnand %p1868_p10, %p1862_p7 }
  0x53   :  { %1872 = shalt.err (!%p1869_p11)
}
  0x54   :  { %s1912_s3 = smov 64   ;;  %s1913_s20 = smov 4  }
  0x55   :  { %81 = dma.hbm_to_vmem [thread:$0]  %s2083_s7, 2048, %s76_s16, [#allocation9], %s1912_s3, %s1912_s3, %s1913_s20  }
  0x56   :  { %1895 = dma.done.wait [#allocation3], 128  }
  0x57   :  { %1896 = vsyncadd [#allocation3], 4294967168 }
  0x58   :  { %1897 = dma.done.wait [#allocation6], 8704  }
  0x59   :  { %1898 = vsyncadd [#allocation6], 4294958592 }
  0x5a   :  { %1899 = dma.done.wait [#allocation9], 10240  }
  0x5b   :  { %1900 = vsyncadd [#allocation9], 4294957056  ;;  %v1914_v0 = vmov 0   ;;  %v1549_v1 = vld [vmem:[#allocation5 + $0x4] ss:$8 sps:$4 sm:$0xff]   ;;  %v100_v5 = vld [vmem:[#allocation2] sm:$0xff]  ;;  %v108_v62 = vlaneseq }
  0x5c   :  { %174 = vmatprep.mubr.bf16.mxu1 %v1914_v0  ;;  %v1551_v2 = vld [vmem:[#allocation5] ss:$8 sps:$4 sm:$0xff]   ;;  %142 = vmatprep.subr.bf16.mxu1 %v1549_v1  ;;  %v1552_v3 = vld [vmem:[#allocation5 + $0x14] ss:$8 sps:$4 sm:$0xff]   ;;  %v1554_v4 = vld [vmem:[#allocation5 + $0x10] ss:$8 sps:$4 sm:$0xff]   ;;  %v101_v9 = vpack.c.bf16 %v100_v5, %v100_v5 }
  0x5d   :  { %143 = vmatpush1.bf16.msra.mxu1 %v1551_v2  ;;  %v1555_v6 = vld [vmem:[#allocation7 + $0x4] ss:$16 sps:$4 sm:$0xff]   ;;  %v1557_v7 = vld [vmem:[#allocation7] ss:$16 sps:$4 sm:$0xff]   ;;  %vm138_vm0 = vcmask 261120   ;;  %v2026_v1 = vshrl.u32 %v108_v62, 7 }
  0x5e   :  { %144 = vmatprep.subr.bf16.mxu1 %v1552_v3  ;;  %593 = vmatprep.subr.bf16.mxu0 %v1555_v6  ;;  %v1558_v8 = vld [vmem:[#allocation7 + $0x24] ss:$16 sps:$4 sm:$0xff]   ;;  %v1560_v10 = vld [vmem:[#allocation7 + $0x20] ss:$16 sps:$4 sm:$0xff]   ;;  %v1605_v39 = vld [vmem:[#allocation7 + $0xc] ss:$16 sps:$4 sm:$0xff]  }
  0x5f   :  { %594 = vmatpush1.bf16.msra.mxu0 %v1557_v7  ;;  %v1561_v11 = vld [vmem:[#allocation7 + $0x44] ss:$16 sps:$4 sm:$0xff]   ;;  %v1563_v12 = vld [vmem:[#allocation7 + $0x40] ss:$16 sps:$4 sm:$0xff]   ;;  %v106_v6 = vld [vmem:[%s2078_s2] sm:$0x3] }
  0x60   :  { %595 = vmatprep.subr.bf16.mxu0 %v1558_v8  ;;  %v1564_v13 = vld [vmem:[#allocation7 + $0x64] ss:$16 sps:$4 sm:$0xff]   ;;  %v1566_v14 = vld [vmem:[#allocation7 + $0x60] ss:$16 sps:$4 sm:$0xff]   ;;  %v2035_v7 = vsub.s32 1, %v2026_v1 }
  0x61   :  { %145 = vmatpush1.bf16.msra.mxu1 %v1554_v4  ;;  %v1567_v15 = vld [vmem:[#allocation7 + $0x84] ss:$16 sps:$4 sm:$0xff]   ;;  %v1569_v16 = vld [vmem:[#allocation7 + $0x80] ss:$16 sps:$4 sm:$0xff]   ;;  %v2029_v4 = vsub.s32 0, %v2026_v1 }
  0x62   :  { %v1570_v17 = vld [vmem:[#allocation7 + $0xa4] ss:$16 sps:$4 sm:$0xff]   ;;  %v1572_v18 = vld [vmem:[#allocation7 + $0xa0] ss:$16 sps:$4 sm:$0xff]  }
  0x63   :  { %596 = vmatpush1.bf16.msra.mxu0 %v1560_v10  ;;  %v1573_v19 = vld [vmem:[#allocation7 + $0xc4] ss:$16 sps:$4 sm:$0xff]   ;;  %v1575_v20 = vld [vmem:[#allocation7 + $0xc0] ss:$16 sps:$4 sm:$0xff]   ;;  %v115_v10 = vrot.slane %v106_v6, %v2035_v7 }
  0x64   :  { %1362 = vmatmul.mubr.msk.bf16.vlgmr.msra.gmra.mrb[0].mxu1 %vm138_vm0, %v101_v9  ;;  %597 = vmatprep.subr.bf16.mxu0 %v1561_v11  ;;  %v1576_v21 = vld [vmem:[#allocation7 + $0xe4] ss:$16 sps:$4 sm:$0xff]   ;;  %v1578_v22 = vld [vmem:[#allocation7 + $0xe0] ss:$16 sps:$4 sm:$0xff]   ;;  %v111_v9 = vrot.slane %v106_v6, %v2029_v4  ;;  %v1758_v6 = vld [vmem:[#allocation10 + $0x28] sm:$0xff]  }
  0x65   :  { %v1579_v23 = vld [vmem:[#allocation7 + $0x104] ss:$16 sps:$4 sm:$0xff]   ;;  %v1581_v24 = vld [vmem:[#allocation7 + $0x100] ss:$16 sps:$4 sm:$0xff]  }
  0x66   :  { %v1582_v25 = vld [vmem:[#allocation7 + $0x124] ss:$16 sps:$4 sm:$0xff]   ;;  %v1584_v26 = vld [vmem:[#allocation7 + $0x120] ss:$16 sps:$4 sm:$0xff]  }
  0x67   :  { %598 = vmatpush1.bf16.msra.mxu0 %v1563_v12  ;;  %v1585_v27 = vld [vmem:[#allocation7 + $0x144] ss:$16 sps:$4 sm:$0xff]   ;;  %v1587_v28 = vld [vmem:[#allocation7 + $0x140] ss:$16 sps:$4 sm:$0xff]  }
  0x68   :  { %599 = vmatprep.subr.bf16.mxu0 %v1564_v13  ;;  %v1588_v29 = vld [vmem:[#allocation7 + $0x164] ss:$16 sps:$4 sm:$0xff]   ;;  %v1590_v30 = vld [vmem:[#allocation7 + $0x160] ss:$16 sps:$4 sm:$0xff]  }
  0x69   :  { %v1591_v31 = vld [vmem:[#allocation7 + $0x184] ss:$16 sps:$4 sm:$0xff]   ;;  %v1593_v32 = vld [vmem:[#allocation7 + $0x180] ss:$16 sps:$4 sm:$0xff]  }
  0x6a   :  { %v1594_v33 = vld [vmem:[#allocation7 + $0x1a4] ss:$16 sps:$4 sm:$0xff]   ;;  %v1596_v34 = vld [vmem:[#allocation7 + $0x1a0] ss:$16 sps:$4 sm:$0xff]  }
  0x6b   :  { %600 = vmatpush1.bf16.msra.mxu0 %v1566_v14  ;;  %v1597_v35 = vld [vmem:[#allocation7 + $0x1c4] ss:$16 sps:$4 sm:$0xff]   ;;  %v1599_v36 = vld [vmem:[#allocation7 + $0x1c0] ss:$16 sps:$4 sm:$0xff]  }
  0x6c   :  { %601 = vmatprep.subr.bf16.mxu0 %v1567_v15  ;;  %v1600_v37 = vld [vmem:[#allocation7 + $0x1e4] ss:$16 sps:$4 sm:$0xff]   ;;  %v1602_v38 = vld [vmem:[#allocation7 + $0x1e0] ss:$16 sps:$4 sm:$0xff]  }
  0x6d   :  { %v1651_v40 = vld [vmem:[#allocation8] ss:$8 sps:$4 sm:$0xff]   ;;  %v1653_v41 = vld [vmem:[#allocation8 + $0x4] ss:$8 sps:$4 sm:$0xff]   ;;  %v1656_v42 = vld [vmem:[#allocation8 + $0x14] ss:$8 sps:$4 sm:$0xff]  }
  0x6e   :  { %1079 = vmatprep.subr.bf16.mxu1 %v1653_v41  ;;  %v1654_v43 = vld [vmem:[#allocation8 + $0x10] ss:$8 sps:$4 sm:$0xff]   ;;  %v1659_v44 = vld [vmem:[#allocation8 + $0x24] ss:$8 sps:$4 sm:$0xff]   ;;  %v1657_v45 = vld [vmem:[#allocation8 + $0x20] ss:$8 sps:$4 sm:$0xff]  }
  0x6f   :  { %602 = vmatpush1.bf16.msra.mxu0 %v1569_v16  ;;  %1080 = vmatpush1.bf16.msra.mxu1 %v1651_v40  ;;  %v1662_v46 = vld [vmem:[#allocation8 + $0x34] ss:$8 sps:$4 sm:$0xff]   ;;  %v1660_v47 = vld [vmem:[#allocation8 + $0x30] ss:$8 sps:$4 sm:$0xff]   ;;  %v1665_v48 = vld [vmem:[#allocation8 + $0x44] ss:$8 sps:$4 sm:$0xff]  }
  0x70   :  { %603 = vmatprep.subr.bf16.mxu0 %v1570_v17  ;;  %1081 = vmatprep.subr.bf16.mxu1 %v1656_v42  ;;  %v1663_v49 = vld [vmem:[#allocation8 + $0x40] ss:$8 sps:$4 sm:$0xff]   ;;  %v1668_v50 = vld [vmem:[#allocation8 + $0x54] ss:$8 sps:$4 sm:$0xff]   ;;  %v1666_v51 = vld [vmem:[#allocation8 + $0x50] ss:$8 sps:$4 sm:$0xff]  }
  0x71   :  { %v1671_v52 = vld [vmem:[#allocation8 + $0x64] ss:$8 sps:$4 sm:$0xff]   ;;  %v1669_v53 = vld [vmem:[#allocation8 + $0x60] ss:$8 sps:$4 sm:$0xff]   ;;  %v1674_v54 = vld [vmem:[#allocation8 + $0x74] ss:$8 sps:$4 sm:$0xff]  }
  0x72   :  { %v1672_v55 = vld [vmem:[#allocation8 + $0x70] ss:$8 sps:$4 sm:$0xff]   ;;  %v1677_v56 = vld [vmem:[#allocation8 + $0x84] ss:$8 sps:$4 sm:$0xff]   ;;  %v1675_v57 = vld [vmem:[#allocation8 + $0x80] ss:$8 sps:$4 sm:$0xff]  }
  0x73   :  { %604 = vmatpush1.bf16.msra.mxu0 %v1572_v18  ;;  %1082 = vmatpush1.bf16.msra.mxu1 %v1654_v43  ;;  %v1680_v58 = vld [vmem:[#allocation8 + $0x94] ss:$8 sps:$4 sm:$0xff]   ;;  %v1678_v59 = vld [vmem:[#allocation8 + $0x90] ss:$8 sps:$4 sm:$0xff]   ;;  %v1683_v60 = vld [vmem:[#allocation8 + $0xa4] ss:$8 sps:$4 sm:$0xff]  }
  0x74   :  { %605 = vmatprep.subr.bf16.mxu0 %v1573_v19  ;;  %1083 = vmatprep.subr.bf16.mxu1 %v1659_v44  ;;  %v1681_v61 = vld [vmem:[#allocation8 + $0xa0] ss:$8 sps:$4 sm:$0xff]   ;;  %v1686_v63 = vld [vmem:[#allocation8 + $0xb4] ss:$8 sps:$4 sm:$0xff]   ;;  %v1684_v0 = vld [vmem:[#allocation8 + $0xb0] ss:$8 sps:$4 sm:$0xff]  }
  0x75   :  { %v1689_v2 = vld [vmem:[#allocation8 + $0xc4] ss:$8 sps:$4 sm:$0xff]   ;;  %v1687_v3 = vld [vmem:[#allocation8 + $0xc0] ss:$8 sps:$4 sm:$0xff]   ;;  %v1692_v5 = vld [vmem:[#allocation8 + $0xd4] ss:$8 sps:$4 sm:$0xff]  }
  0x76   :  { %v1690_v8 = vld [vmem:[#allocation8 + $0xd0] ss:$8 sps:$4 sm:$0xff]   ;;  %v1635_v40 = vld [vmem:[#allocation7 + $0x14c] ss:$16 sps:$4 sm:$0xff]  }
  0x77   :  { %606 = vmatpush1.bf16.msra.mxu0 %v1575_v20  ;;  %1084 = vmatpush1.bf16.msra.mxu1 %v1657_v45  ;;  %v1603_v20 = vld [vmem:[#allocation7 + $0x8] ss:$16 sps:$4 sm:$0xff]   ;;  %v1638_v42 = vld [vmem:[#allocation7 + $0x16c] ss:$16 sps:$4 sm:$0xff]   ;;  %v1752_v62 = vld [vmem:[#allocation10 + $0x10] sm:$0xff]  }
  0x78   :  { %607 = vmatprep.subr.bf16.mxu0 %v1576_v21  ;;  %1085 = vmatprep.subr.bf16.mxu1 %v1662_v46  ;;  %v1633_v41 = vld [vmem:[#allocation7 + $0x148] ss:$16 sps:$4 sm:$0xff]   ;;  %v1641_v44 = vld [vmem:[#allocation7 + $0x18c] ss:$16 sps:$4 sm:$0xff]  }
  0x79   :  { %v1636_v43 = vld [vmem:[#allocation7 + $0x168] ss:$16 sps:$4 sm:$0xff]   ;;  %v1644_v46 = vld [vmem:[#allocation7 + $0x1ac] ss:$16 sps:$4 sm:$0xff]  }
  0x7a   :  { %v1639_v45 = vld [vmem:[#allocation7 + $0x188] ss:$16 sps:$4 sm:$0xff]  }
  0x7b   :  { %608 = vmatpush1.bf16.msra.mxu0 %v1578_v22  ;;  %1086 = vmatpush1.bf16.msra.mxu1 %v1660_v47  ;;  %v1608_v22 = vld [vmem:[#allocation7 + $0x2c] ss:$16 sps:$4 sm:$0xff]   ;;  %v1642_v47 = vld [vmem:[#allocation7 + $0x1a8] ss:$16 sps:$4 sm:$0xff]  }
  0x7c   :  { %609 = vmatprep.subr.bf16.mxu0 %v1579_v23  ;;  %1087 = vmatprep.subr.bf16.mxu1 %v1665_v48  ;;  %v1606_v23 = vld [vmem:[#allocation7 + $0x28] ss:$16 sps:$4 sm:$0xff]   ;;  %v1647_v48 = vld [vmem:[#allocation7 + $0x1cc] ss:$16 sps:$4 sm:$0xff]  }
  0x7f   :  { %610 = vmatpush1.bf16.msra.mxu0 %v1581_v24  ;;  %1088 = vmatpush1.bf16.msra.mxu1 %v1663_v49  ;;  %v1611_v24 = vld [vmem:[#allocation7 + $0x4c] ss:$16 sps:$4 sm:$0xff]   ;;  %v1645_v49 = vld [vmem:[#allocation7 + $0x1c8] ss:$16 sps:$4 sm:$0xff]  }
  0x80   :  { %611 = vmatprep.subr.bf16.mxu0 %v1582_v25  ;;  %1089 = vmatprep.subr.bf16.mxu1 %v1668_v50  ;;  %v1609_v25 = vld [vmem:[#allocation7 + $0x48] ss:$16 sps:$4 sm:$0xff]   ;;  %v1650_v50 = vld [vmem:[#allocation7 + $0x1ec] ss:$16 sps:$4 sm:$0xff]  }
  0x83   :  { %612 = vmatpush1.bf16.msra.mxu0 %v1584_v26  ;;  %1090 = vmatpush1.bf16.msra.mxu1 %v1666_v51  ;;  %v1614_v26 = vld [vmem:[#allocation7 + $0x6c] ss:$16 sps:$4 sm:$0xff]   ;;  %v1648_v51 = vld [vmem:[#allocation7 + $0x1e8] ss:$16 sps:$4 sm:$0xff]  }
  0x84   :  { %613 = vmatprep.subr.bf16.mxu0 %v1585_v27  ;;  %1091 = vmatprep.subr.bf16.mxu1 %v1671_v52  ;;  %v1612_v27 = vld [vmem:[#allocation7 + $0x68] ss:$16 sps:$4 sm:$0xff]   ;;  %v1695_v52 = vld [vmem:[#allocation8 + $0xe4] ss:$8 sps:$4 sm:$0xff]  }
  0x87   :  { %614 = vmatpush1.bf16.msra.mxu0 %v1587_v28  ;;  %1092 = vmatpush1.bf16.msra.mxu1 %v1669_v53  ;;  %v1617_v28 = vld [vmem:[#allocation7 + $0x8c] ss:$16 sps:$4 sm:$0xff]   ;;  %v1693_v53 = vld [vmem:[#allocation8 + $0xe0] ss:$8 sps:$4 sm:$0xff]  }
  0x88   :  { %615 = vmatprep.subr.bf16.mxu0 %v1588_v29  ;;  %1093 = vmatprep.subr.bf16.mxu1 %v1674_v54  ;;  %v1615_v29 = vld [vmem:[#allocation7 + $0x88] ss:$16 sps:$4 sm:$0xff]   ;;  %v1698_v54 = vld [vmem:[#allocation8 + $0xf4] ss:$8 sps:$4 sm:$0xff]  }
  0x8b   :  { %616 = vmatpush1.bf16.msra.mxu0 %v1590_v30  ;;  %1094 = vmatpush1.bf16.msra.mxu1 %v1672_v55  ;;  %v1620_v30 = vld [vmem:[#allocation7 + $0xac] ss:$16 sps:$4 sm:$0xff]   ;;  %v1696_v55 = vld [vmem:[#allocation8 + $0xf0] ss:$8 sps:$4 sm:$0xff]  }
  0x8c   :  { %617 = vmatprep.subr.bf16.mxu0 %v1591_v31  ;;  %1095 = vmatprep.subr.bf16.mxu1 %v1677_v56  ;;  %v1618_v31 = vld [vmem:[#allocation7 + $0xa8] ss:$16 sps:$4 sm:$0xff]   ;;  %v1701_v56 = vld [vmem:[#allocation8 + $0x104] ss:$8 sps:$4 sm:$0xff]  }
  0x8f   :  { %618 = vmatpush1.bf16.msra.mxu0 %v1593_v32  ;;  %1096 = vmatpush1.bf16.msra.mxu1 %v1675_v57  ;;  %v1623_v32 = vld [vmem:[#allocation7 + $0xcc] ss:$16 sps:$4 sm:$0xff]   ;;  %v1747_v57 = vld [vmem:[#allocation10 + $0x40] sm:$0xff]  }
  0x90   :  { %619 = vmatprep.subr.bf16.mxu0 %v1594_v33  ;;  %1097 = vmatprep.subr.bf16.mxu1 %v1680_v58  ;;  %v1621_v33 = vld [vmem:[#allocation7 + $0xc8] ss:$16 sps:$4 sm:$0xff]   ;;  %v1748_v58 = vld [vmem:[#allocation10] sm:$0xff]  }
  0x93   :  { %620 = vmatpush1.bf16.msra.mxu0 %v1596_v34  ;;  %1098 = vmatpush1.bf16.msra.mxu1 %v1678_v59  ;;  %v1626_v34 = vld [vmem:[#allocation7 + $0xec] ss:$16 sps:$4 sm:$0xff]  }
  0x94   :  { %621 = vmatprep.subr.bf16.mxu0 %v1597_v35  ;;  %1099 = vmatprep.subr.bf16.mxu1 %v1683_v60  ;;  %v1624_v35 = vld [vmem:[#allocation7 + $0xe8] ss:$16 sps:$4 sm:$0xff]  }
  0x95   :  { %v1749_v59 = vld [vmem:[#allocation10 + $0x48] sm:$0xff]  }
  0x96   :  { %v1750_v60 = vld [vmem:[#allocation10 + $0x8] sm:$0xff]  }
  0x97   :  { %622 = vmatpush1.bf16.msra.mxu0 %v1599_v36  ;;  %1100 = vmatpush1.bf16.msra.mxu1 %v1681_v61  ;;  %v1629_v36 = vld [vmem:[#allocation7 + $0x10c] ss:$16 sps:$4 sm:$0xff]   ;;  %v1751_v61 = vld [vmem:[#allocation10 + $0x50] sm:$0xff]  }
  0x98   :  { %623 = vmatprep.subr.bf16.mxu0 %v1600_v37  ;;  %1101 = vmatprep.subr.bf16.mxu1 %v1686_v63  ;;  %v1627_v37 = vld [vmem:[#allocation7 + $0x108] ss:$16 sps:$4 sm:$0xff]  }
  0x99   :  { %v1753_v63 = vld [vmem:[#allocation10 + $0x58] sm:$0xff]  }
  0x9b   :  { %624 = vmatpush1.bf16.msra.mxu0 %v1602_v38  ;;  %1102 = vmatpush1.bf16.msra.mxu1 %v1684_v0  ;;  %v1632_v38 = vld [vmem:[#allocation7 + $0x12c] ss:$16 sps:$4 sm:$0xff]  }
  0x9c   :  { %634 = vmatprep.subr.bf16.mxu0 %v1605_v39  ;;  %1103 = vmatprep.subr.bf16.mxu1 %v1689_v2  ;;  %v1630_v39 = vld [vmem:[#allocation7 + $0x128] ss:$16 sps:$4 sm:$0xff]   ;;  %v1755_v2 = vld [vmem:[#allocation10 + $0x60] sm:$0xff]  }
  0x9d   :  { %v1754_v0 = vld [vmem:[#allocation10 + $0x18] sm:$0xff]  }
  0x9f   :  { %1104 = vmatpush1.bf16.msra.mxu1 %v1687_v3  ;;  %v1756_v3 = vld [vmem:[#allocation10 + $0x20] sm:$0xff]  }
  0xa0   :  { %1105 = vmatprep.subr.bf16.mxu1 %v1692_v5  ;;  %v1757_v5 = vld [vmem:[#allocation10 + $0x68] sm:$0xff]  }
  0xa3   :  { %1106 = vmatpush1.bf16.msra.mxu1 %v1690_v8  ;;  %v2046_v8 = vld [vmem:[%s2080_s4] sm:$0xf] }
  0xa4   :  { %1107 = vmatprep.subr.bf16.mxu1 %v1695_v52 }
  0xa7   :  { %1108 = vmatpush1.bf16.msra.mxu1 %v1693_v53  ;;  %v1741_v53 = vld [vmem:[#allocation8 + $0x1e0] ss:$8 sps:$4 sm:$0xff]  }
  0xa8   :  { %1109 = vmatprep.subr.bf16.mxu1 %v1698_v54  ;;  %v1746_v54 = vld [vmem:[#allocation8 + $0x1f4] ss:$8 sps:$4 sm:$0xff]  }
  0xab   :  { %1110 = vmatpush1.bf16.msra.mxu1 %v1696_v55 }
  0xac   :  { %1120 = vmatprep.subr.bf16.mxu1 %v1701_v56 }
 0x137   :  { %v176_v11 = vpop.f32.mrb[0].mxu1 }
 0x138   :  { %v177_v12 = vadd.f32 %v176_v11, %v111_v9  ;;  %v178_v13 = vpop.f32.mrb[1].mxu1  ;;  %v256_v9 = vrot.slane %v2046_v8, %v2029_v4 }
 0x139   :  { %v179_v14 = vadd.f32 %v178_v13, %v115_v10  ;;  %v180_v15 = vpop.f32.mrb[2].mxu1  ;;  %v260_v10 = vrot.slane %v2046_v8, %v2035_v7 }
 0x13a   :  { %v183_v16 = vmax.f32 %v177_v12, 0.0  ;;  %v181_v17 = vpop.f32.mrb[3].mxu1 }
 0x13b   :  { %v184_v18 = vmax.f32 %v179_v14, 0.0 }
 0x13c   :  { %v2039_v21 = vpack.c.bf16 %v183_v16, %v183_v16 }
 0x13d   :  { %v186_v19 = vpack.c.bf16 %v184_v18, %v184_v18 }
 0x13f   :  { %625 = vmatprep.mubr.bf16.mxu0 %v186_v19 }
 0x140   :  { %626 = vmatmul.mubr.bf16.vlgmr.msra.gmra.mrb[0].mxu0 %v2039_v21 }
 0x141   :  { %635 = vmatpush1.bf16.msra.mxu0 %v1603_v20  ;;  %666 = vmatprep.mubr.bf16.mxu0 %v186_v19  ;;  %v1699_v20 = vld [vmem:[#allocation8 + $0x100] ss:$8 sps:$4 sm:$0xff]  }
 0x142   :  { %636 = vmatprep.subr.bf16.mxu0 %v1608_v22  ;;  %v1704_v22 = vld [vmem:[#allocation8 + $0x114] ss:$8 sps:$4 sm:$0xff]  }
 0x145   :  { %637 = vmatpush1.bf16.msra.mxu0 %v1606_v23  ;;  %v1702_v23 = vld [vmem:[#allocation8 + $0x110] ss:$8 sps:$4 sm:$0xff]  }
 0x146   :  { %638 = vmatprep.subr.bf16.mxu0 %v1611_v24  ;;  %v1707_v24 = vld [vmem:[#allocation8 + $0x124] ss:$8 sps:$4 sm:$0xff]  }
 0x149   :  { %639 = vmatpush1.bf16.msra.mxu0 %v1609_v25  ;;  %v1705_v25 = vld [vmem:[#allocation8 + $0x120] ss:$8 sps:$4 sm:$0xff]  }
 0x14a   :  { %640 = vmatprep.subr.bf16.mxu0 %v1614_v26  ;;  %v1710_v26 = vld [vmem:[#allocation8 + $0x134] ss:$8 sps:$4 sm:$0xff]  }
 0x14d   :  { %641 = vmatpush1.bf16.msra.mxu0 %v1612_v27  ;;  %v1708_v27 = vld [vmem:[#allocation8 + $0x130] ss:$8 sps:$4 sm:$0xff]  }
 0x14e   :  { %642 = vmatprep.subr.bf16.mxu0 %v1617_v28  ;;  %v1713_v28 = vld [vmem:[#allocation8 + $0x144] ss:$8 sps:$4 sm:$0xff]  }
 0x151   :  { %643 = vmatpush1.bf16.msra.mxu0 %v1615_v29  ;;  %v1711_v29 = vld [vmem:[#allocation8 + $0x140] ss:$8 sps:$4 sm:$0xff]  }
 0x152   :  { %644 = vmatprep.subr.bf16.mxu0 %v1620_v30  ;;  %v1716_v30 = vld [vmem:[#allocation8 + $0x154] ss:$8 sps:$4 sm:$0xff]  }
 0x155   :  { %645 = vmatpush1.bf16.msra.mxu0 %v1618_v31  ;;  %v1714_v31 = vld [vmem:[#allocation8 + $0x150] ss:$8 sps:$4 sm:$0xff]  }
 0x156   :  { %646 = vmatprep.subr.bf16.mxu0 %v1623_v32  ;;  %v1719_v32 = vld [vmem:[#allocation8 + $0x164] ss:$8 sps:$4 sm:$0xff]  }
 0x159   :  { %647 = vmatpush1.bf16.msra.mxu0 %v1621_v33  ;;  %v1717_v33 = vld [vmem:[#allocation8 + $0x160] ss:$8 sps:$4 sm:$0xff]  }
 0x15a   :  { %648 = vmatprep.subr.bf16.mxu0 %v1626_v34  ;;  %v1722_v34 = vld [vmem:[#allocation8 + $0x174] ss:$8 sps:$4 sm:$0xff]  }
 0x15d   :  { %649 = vmatpush1.bf16.msra.mxu0 %v1624_v35  ;;  %v1720_v35 = vld [vmem:[#allocation8 + $0x170] ss:$8 sps:$4 sm:$0xff]  }
 0x15e   :  { %650 = vmatprep.subr.bf16.mxu0 %v1629_v36  ;;  %v1725_v36 = vld [vmem:[#allocation8 + $0x184] ss:$8 sps:$4 sm:$0xff]  }
 0x161   :  { %651 = vmatpush1.bf16.msra.mxu0 %v1627_v37  ;;  %v1723_v37 = vld [vmem:[#allocation8 + $0x180] ss:$8 sps:$4 sm:$0xff]  }
 0x162   :  { %652 = vmatprep.subr.bf16.mxu0 %v1632_v38  ;;  %v1728_v38 = vld [vmem:[#allocation8 + $0x194] ss:$8 sps:$4 sm:$0xff]  }
 0x165   :  { %653 = vmatpush1.bf16.msra.mxu0 %v1630_v39  ;;  %v1726_v39 = vld [vmem:[#allocation8 + $0x190] ss:$8 sps:$4 sm:$0xff]  }
 0x166   :  { %654 = vmatprep.subr.bf16.mxu0 %v1635_v40  ;;  %v1731_v40 = vld [vmem:[#allocation8 + $0x1a4] ss:$8 sps:$4 sm:$0xff]  }
 0x169   :  { %655 = vmatpush1.bf16.msra.mxu0 %v1633_v41  ;;  %v1729_v41 = vld [vmem:[#allocation8 + $0x1a0] ss:$8 sps:$4 sm:$0xff]  }
 0x16a   :  { %656 = vmatprep.subr.bf16.mxu0 %v1638_v42  ;;  %v1734_v42 = vld [vmem:[#allocation8 + $0x1b4] ss:$8 sps:$4 sm:$0xff]  }
 0x16d   :  { %657 = vmatpush1.bf16.msra.mxu0 %v1636_v43  ;;  %v1732_v43 = vld [vmem:[#allocation8 + $0x1b0] ss:$8 sps:$4 sm:$0xff]  }
 0x16e   :  { %658 = vmatprep.subr.bf16.mxu0 %v1641_v44  ;;  %v1737_v44 = vld [vmem:[#allocation8 + $0x1c4] ss:$8 sps:$4 sm:$0xff]  }
 0x171   :  { %659 = vmatpush1.bf16.msra.mxu0 %v1639_v45  ;;  %v1735_v45 = vld [vmem:[#allocation8 + $0x1c0] ss:$8 sps:$4 sm:$0xff]  }
 0x172   :  { %660 = vmatprep.subr.bf16.mxu0 %v1644_v46  ;;  %v1740_v46 = vld [vmem:[#allocation8 + $0x1d4] ss:$8 sps:$4 sm:$0xff]  }
 0x175   :  { %661 = vmatpush1.bf16.msra.mxu0 %v1642_v47  ;;  %v263_v47 = vsub.s32 2, %v2026_v1 }
 0x176   :  { %662 = vmatprep.subr.bf16.mxu0 %v1647_v48  ;;  %v1738_v48 = vld [vmem:[#allocation8 + $0x1d0] ss:$8 sps:$4 sm:$0xff]  }
 0x179   :  { %663 = vmatpush1.bf16.msra.mxu0 %v1645_v49  ;;  %v267_v49 = vsub.s32 3, %v2026_v1 }
 0x17a   :  { %664 = vmatprep.subr.bf16.mxu0 %v1650_v50  ;;  %v1743_v50 = vld [vmem:[#allocation8 + $0x1e4] ss:$8 sps:$4 sm:$0xff]  }
 0x17b   :  { %v268_v52 = vrot.slane %v2046_v8, %v267_v49 }
 0x17d   :  { %665 = vmatpush1.bf16.msra.mxu0 %v1648_v51  ;;  %v264_v51 = vrot.slane %v2046_v8, %v263_v47  ;;  %v747_v8 = vld [vmem:[%s2082_s6] sm:$0x3]  ;;  %s1915_s6 = smov [#allocation11]  }
 0x17e   :  { %1508 = vmatprep.subr.bf16.mxu0 %v1747_v57  ;;  %s1347_s13 = sshll.u32 %s1915_s6, 4  ;;  %s1348_s13 = int_to_ptr.vmem [resolvable:$true] %s1347_s13 }
 0x17f   :  { %s1873_s1 = scalar_lea.vmem %s1348_s13, 128  ;;  %p1878_p13 = scmp.lt.s32.totalorder %s1348_s13, %s1348_s13 }
 0x180   :  { %667 = vmatmul.mubr.bf16.vlgmr.msra.gmra.mrb[4].mxu0 %v2039_v21  ;;  %p1874_p12 = scmp.ne.s32.totalorder %s1348_s13, %s1873_s1  ;;  %p1879_p0 = scmp.lt.s32.totalorder %s1873_s1, %s1873_s1 }
 0x181   :  { %1509 = vmatpush3.bf16.msra.mxu0 %v1748_v58 }
 0x182   :  { %1510 = vmatprep.subr.bf16.mxu0 %v1749_v59  ;;  %p1880_p1 = por %p1879_p0, %p1878_p13 }
 0x184   :  { %p1881_p2 = pnand %p1880_p1, %p1874_p12 }
 0x185   :  { %1511 = vmatpush3.bf16.msra.mxu0 %v1750_v60  ;;  %v1744_v60 = vld [vmem:[#allocation8 + $0x1f0] ss:$8 sps:$4 sm:$0xff]  }
 0x186   :  { %1512 = vmatprep.subr.bf16.mxu0 %v1751_v61 }
 0x189   :  { %1513 = vmatpush3.bf16.msra.mxu0 %v1752_v62 }
 0x18a   :  { %1514 = vmatprep.subr.bf16.mxu0 %v1753_v63 }
 0x18d   :  { %1515 = vmatpush3.bf16.msra.mxu0 %v1754_v0 }
 0x18e   :  { %1516 = vmatprep.subr.bf16.mxu0 %v1755_v2  ;;  %v1759_v2 = vld [vmem:[#allocation10 + $0x70] sm:$0xff]  }
 0x191   :  { %1517 = vmatpush3.bf16.msra.mxu0 %v1756_v3  ;;  %v1760_v3 = vld [vmem:[#allocation10 + $0x30] sm:$0xff]  }
 0x192   :  { %1518 = vmatprep.subr.bf16.mxu0 %v1757_v5  ;;  %v1761_v5 = vld [vmem:[#allocation10 + $0x78] sm:$0xff]  }
 0x195   :  { %1519 = vmatpush3.bf16.msra.mxu0 %v1758_v6  ;;  %v1762_v6 = vld [vmem:[#allocation10 + $0x38] sm:$0xff]  }
 0x196   :  { %1520 = vmatprep.subr.bf16.mxu0 %v1759_v2 }
 0x199   :  { %1521 = vmatpush3.bf16.msra.mxu0 %v1760_v3 }
 0x19a   :  { %1522 = vmatprep.subr.bf16.mxu0 %v1761_v5 }
 0x19d   :  { %1523 = vmatpush3.bf16.msra.mxu0 %v1762_v6 }
 0x213   :  { %v627_v11 = vpop.f32.mrb[0].mxu0 }
 0x214   :  { %v628_v12 = vadd.f32 %v627_v11, %v256_v9  ;;  %v629_v13 = vpop.f32.mrb[1].mxu0  ;;  %v752_v9 = vrot.slane %v747_v8, %v2029_v4 }
 0x215   :  { %v630_v14 = vadd.f32 %v629_v13, %v260_v10  ;;  %v631_v15 = vpop.f32.mrb[2].mxu0  ;;  %v756_v10 = vrot.slane %v747_v8, %v2035_v7 }
 0x216   :  { %v675_v16 = vmax.f32 %v628_v12, 0.0  ;;  %v632_v17 = vpop.f32.mrb[3].mxu0 }
 0x217   :  { %v676_v18 = vmax.f32 %v630_v14, 0.0 }
 0x218   :  { %v679_v21 = vpack.c.bf16 %v675_v16, %v675_v16 }
 0x219   :  { %v680_v19 = vpack.c.bf16 %v676_v18, %v676_v18 }
 0x21b   :  { %1111 = vmatprep.mubr.bf16.mxu1 %v680_v19 }
 0x21c   :  { %1112 = vmatmul.mubr.bf16.vlgmr.msra.gmra.mrb[4].mxu1 %v679_v21 }
 0x21d   :  { %1121 = vmatpush1.bf16.msra.mxu1 %v1699_v20 }
 0x21e   :  { %1122 = vmatprep.subr.bf16.mxu1 %v1704_v22  ;;  %v1491_v22 = vld [vmem:[%s2084_s8] ss:$0 sm:$0xff] }
 0x221   :  { %1123 = vmatpush1.bf16.msra.mxu1 %v1702_v23 }
 0x222   :  { %1124 = vmatprep.subr.bf16.mxu1 %v1707_v24 }
 0x225   :  { %1125 = vmatpush1.bf16.msra.mxu1 %v1705_v25 }
 0x226   :  { %1126 = vmatprep.subr.bf16.mxu1 %v1710_v26 }
 0x229   :  { %1127 = vmatpush1.bf16.msra.mxu1 %v1708_v27 }
 0x22a   :  { %1128 = vmatprep.subr.bf16.mxu1 %v1713_v28 }
 0x22d   :  { %1129 = vmatpush1.bf16.msra.mxu1 %v1711_v29 }
 0x22e   :  { %1130 = vmatprep.subr.bf16.mxu1 %v1716_v30 }
 0x231   :  { %1131 = vmatpush1.bf16.msra.mxu1 %v1714_v31 }
 0x232   :  { %1132 = vmatprep.subr.bf16.mxu1 %v1719_v32 }
 0x235   :  { %1133 = vmatpush1.bf16.msra.mxu1 %v1717_v33 }
 0x236   :  { %1134 = vmatprep.subr.bf16.mxu1 %v1722_v34 }
 0x239   :  { %1135 = vmatpush1.bf16.msra.mxu1 %v1720_v35 }
 0x23a   :  { %1136 = vmatprep.subr.bf16.mxu1 %v1725_v36 }
 0x23d   :  { %1137 = vmatpush1.bf16.msra.mxu1 %v1723_v37 }
 0x23e   :  { %1138 = vmatprep.subr.bf16.mxu1 %v1728_v38 }
 0x241   :  { %1139 = vmatpush1.bf16.msra.mxu1 %v1726_v39 }
 0x242   :  { %1140 = vmatprep.subr.bf16.mxu1 %v1731_v40 }
 0x245   :  { %1141 = vmatpush1.bf16.msra.mxu1 %v1729_v41 }
 0x246   :  { %1142 = vmatprep.subr.bf16.mxu1 %v1734_v42 }
 0x249   :  { %1143 = vmatpush1.bf16.msra.mxu1 %v1732_v43 }
 0x24a   :  { %1144 = vmatprep.subr.bf16.mxu1 %v1737_v44 }
 0x24d   :  { %1145 = vmatpush1.bf16.msra.mxu1 %v1735_v45 }
 0x24e   :  { %1146 = vmatprep.subr.bf16.mxu1 %v1740_v46 }
 0x251   :  { %1147 = vmatpush1.bf16.msra.mxu1 %v1738_v48 }
 0x252   :  { %1148 = vmatprep.subr.bf16.mxu1 %v1743_v50 }
 0x253   :  { %v668_v55 = vpop.f32.mrb[4].mxu0 }
 0x254   :  { %v669_v56 = vadd.f32 %v668_v55, %v264_v51  ;;  %v670_v57 = vpop.f32.mrb[5].mxu0 }
 0x255   :  { %v671_v58 = vadd.f32 %v670_v57, %v268_v52  ;;  %v672_v59 = vpop.f32.mrb[6].mxu0  ;;  %1149 = vmatpush1.bf16.msra.mxu1 %v1741_v53 }
 0x256   :  { %v677_v61 = vmax.f32 %v669_v56, 0.0  ;;  %v673_v62 = vpop.f32.mrb[7].mxu0  ;;  %1150 = vmatprep.subr.bf16.mxu1 %v1746_v54 }
 0x257   :  { %v678_v1 = vmax.f32 %v671_v58, 0.0 }
 0x258   :  { %v681_v0 = vpack.c.bf16 %v677_v61, %v677_v61 }
 0x259   :  { %v682_v63 = vpack.c.bf16 %v678_v1, %v678_v1  ;;  %1151 = vmatpush1.bf16.msra.mxu1 %v1744_v60 }
 0x25b   :  { %1152 = vmatprep.mubr.bf16.mxu1 %v682_v63 }
 0x25c   :  { %1153 = vmatmul.mubr.bf16.vlgmr.msra.gmra.mrb[4].mxu1 %v681_v0 }
 0x32f   :  { %v1154_v11 = vpop.f32.mrb[4].mxu1 }
 0x330   :  { %v1530_v12 = vadd.f32 %v1154_v11, %v752_v9  ;;  %v1156_v13 = vpop.f32.mrb[5].mxu1 }
 0x331   :  { %v1531_v14 = vadd.f32 %v1156_v13, %v756_v10  ;;  %v1158_v15 = vpop.f32.mrb[6].mxu1 }
 0x332   :  { %v1161_v16 = vmax.f32 %v1530_v12, 0.0  ;;  %v1159_v17 = vpop.f32.mrb[7].mxu1 }
 0x333   :  { %v1162_v18 = vmax.f32 %v1531_v14, 0.0 }
 0x334   :  { %v1163_v20 = vpack.c.bf16 %v1161_v16, %v1161_v16 }
 0x335   :  { %v1164_v19 = vpack.c.bf16 %v1162_v18, %v1162_v18 }
 0x337   :  { %1332 = vmatprep.mubr.bf16.mxu0 %v1164_v19 }
 0x338   :  { %1333 = vmatmul.mubr.bf16.vlgmr.msra.gmra.mrb[8].mxu0 %v1163_v20 }
 0x40b   :  { %v1524_v21 = vpop.f32.mrb[8].mxu0 }
 0x40c   :  { %v1525_v4 = vpop.f32.mrb[9].mxu0 }
 0x40d   :  { %v1526_v7 = vadd.f32 %v1525_v4, %v1524_v21  ;;  %v1527_v23 = vpop.f32.mrb[10].mxu0 }
 0x40e   :  { %v1528_v24 = vpop.f32.mrb[11].mxu0 }
 0x40f   :  { %v1335_v25 = vadd.f32 %v1526_v7, %v1491_v22 }
 0x411   :  { %1340 = vst [vmem:[#allocation11] sm:$0xff] %v1335_v25 }
 0x412   :  { %1884 = shalt.err (!%p1881_p2)
}
 0x413   :  { %s1885_s8 = scalar_lea.hbm %s2085_s9, 128 }
 0x414   :  { %p1886_p3 = scmp.ne.s32.totalorder %s2085_s9, %s1885_s8  ;;  %p1889_p4 = scmp.lt.u32.totalorder %s1885_s8, %s2085_s9 }
 0x416   :  { %p1891_p5 = pnand %p1889_p4, %p1886_p3 }
 0x418   :  { %1894 = shalt.err (!%p1891_p5)
}
 0x419   :  { %1350 = dma.vmem_to_hbm [thread:$0]  %s1348_s13, 128, %s2085_s9, [#allocation4]  }
 0x41a   :  { %1901 = dma.done.wait [#allocation4], 128  }
 0x41b   :  { %1902 = vsyncadd [#allocation4], 4294967168 }
 0x41c   :  { %1354 = vsyncpa [#allocation3], 1 }
 0x41d   :  { %1355 = vsyncpa [#allocation6], 1 }
 0x41e   :  { %1356 = vsyncpa [#allocation9], 1 }
 0x41f   :  { %1357 = vsyncpa [#allocation4], 1 }

</bundles_post_ra>
